<compile_context>
chip_gen: v7x
topology: tpu7x:2x2x1
jax: 0.10.0
libtpu: 0.0.40
codegen_flags: <defaults>
</compile_context>

<pallas_src>
import jax
import jax.numpy as jnp
from jax import lax
from jax.experimental import pallas as pl
from jax.experimental.pallas import tpu as pltpu


def instance_gating_kernel(ui_ref, s2_ref, w1_ref, out_ref):
    # ui : (L, E, TB)  native dtype, batch on lanes (dense)
    # s2 : (L, TB)     f32, precomputed user_embedding @ w2.T (transposed)
    # w1 : (E, 1)      tiny replicated weight column
    # out: (E, TB)
    ui = ui_ref[...]                              # no whole-tile f32 copy
    s2 = s2_ref[...]                              # (L, TB) f32
    w1 = w1_ref[...].astype(jnp.float32)          # (E, 1) f32

    # s1[l, b] = sum_e w1[e] * ui[l, e, b]; the f32 w1 broadcast promotes the
    # product to f32, reduction runs over the E sublane axis.
    s1 = jnp.sum(ui * w1[None, :, :], axis=1)     # (L, TB) f32

    score = jax.nn.sigmoid(s1 + s2)               # (L, TB) f32

    # Weighted pooling over the sequence axis.  L is the leading (untiled)
    # axis, E stays on sublanes and batch on lanes, so this is plain vector
    # multiply-adds plus a cheap per-l sublane broadcast of score -- no
    # lane<->sublane relayout.
    num = jnp.sum(score[:, None, :] * ui, axis=0)       # (E, TB) f32
    den = jnp.sum(score, axis=0, keepdims=True)         # (1, TB) f32

    # Exact reciprocal keeps bitwise-tight accuracy; approx=True would move it
    # fully onto the EUP slot at ~1e-3 relative error in the normalizer.
    inv_den = pl.reciprocal(den, approx=False)
    out_ref[...] = (num * inv_den).astype(out_ref.dtype)


def instance_gating(user_item, user_embedding, w1, w2, *, block_b=1024):
    B, L, E = user_item.shape
    assert user_embedding.shape == (B, E)
    assert w1.shape == (1, E)
    assert w2.shape == (L, E)
    out_dtype = user_item.dtype

    # ---- Wrapper-side layout plumbing (lane-dense batch axis) -------------
    # In production the caller should keep activations in (L, E, B) so this
    # transpose pass over the big tensor disappears entirely.
    ui_t = jnp.transpose(user_item, (1, 2, 0))                      # (L, E, B)

    # Hoisted s2 = user_embedding @ w2.T, streamed already in kernel layout.
    s2 = lax.dot_general(user_embedding, w2, (((1,), (1,)), ((), ())),
                         preferred_element_type=jnp.float32)        # (B, L)
    s2_t = jnp.transpose(s2)                                        # (L, B)

    w1_col = jnp.transpose(w1)                                      # (E, 1)

    # ---- Generation-aware VMEM budget --------------------------------------
    try:
        info = pltpu.get_tpu_info()
        vmem_cap = int(getattr(info, "vmem_capacity_bytes", 64 * 1024 * 1024))
    except Exception:  # pragma: no cover - conservative fallback (v7x size)
        vmem_cap = 64 * 1024 * 1024
    vmem_budget = max(16 * 1024 * 1024, (vmem_cap * 3) // 4)

    def _ceil(a, m):
        return (a + m - 1) // m * m

    it = jnp.dtype(out_dtype).itemsize

    def _block_bytes(tb):
        lanes = _ceil(tb, 128)
        ui_b = L * _ceil(E, 8) * lanes * it
        s2_b = _ceil(L, 8) * lanes * 4
        out_b = _ceil(E, 8) * lanes * it
        w1_b = _ceil(E, 8) * 128 * 4
        return 2 * (ui_b + s2_b + out_b + w1_b)   # double-buffered

    # ---- Batch-tile selection ----------------------------------------------
    # Lane axis: tile must be a multiple of 128 or the full extent.  For
    # B > 128 always produce >= 2 grid steps so both TensorCores get work.
    if B <= 128:
        tb = B
    else:
        tb = min(block_b, (B + 1) // 2)
        tb = max(128, (tb // 128) * 128)
        while tb > 128 and _block_bytes(tb) > vmem_budget:
            tb = max(128, (tb // 2 // 128) * 128)

    # Keep the scoped-VMEM limit just above the computed footprint (plus
    # headroom for compiler-internal f32 intermediates), never above budget.
    vmem_limit = int(min(vmem_budget,
                         max(4 * _block_bytes(tb) + (8 << 20), 16 << 20)))

    grid = (pl.cdiv(B, tb),)

    out_t = pl.pallas_call(
        instance_gating_kernel,
        out_shape=jax.ShapeDtypeStruct((E, B), out_dtype),
        grid=grid,
        in_specs=[
            pl.BlockSpec((L, E, tb), lambda b: (0, 0, b)),   # streamed ui
            pl.BlockSpec((L, tb), lambda b: (0, b)),         # streamed s2
            pl.BlockSpec((E, 1), lambda b: (0, 0)),          # replicated w1
        ],
        out_specs=pl.BlockSpec((E, tb), lambda b: (0, b)),
        compiler_params=pltpu.CompilerParams(
            dimension_semantics=("parallel",),
            vmem_limit_bytes=vmem_limit,
        ),
    )(ui_t, s2_t, w1_col)

    return jnp.transpose(out_t)   # (B, E)


def instance_gating_ref(user_item, user_embedding, w1, w2):
    # pure-JAX reference mirroring the PyTorch code
    s1 = user_item @ w1.T                               # (B, L, 1)
    s2 = (user_embedding @ w2.T)[:, :, None]            # (B, L, 1)
    score = jax.nn.sigmoid(s1 + s2)                     # (B, L, 1)
    score = jnp.broadcast_to(score, user_item.shape)    # repeat along E
    out = (score * user_item).sum(axis=1)
    return out / score.sum(axis=1)


if __name__ == "__main__":
    key = jax.random.PRNGKey(0)

    # Test 1: module-default small shapes (batch=2, seq_len=10, embedding=32).
    B, L, E = 2, 10, 32
    k_ui, k_ue, k_w1, k_w2 = jax.random.split(key, 4)
    user_item = jax.random.normal(k_ui, (B, L, E), dtype=jnp.float32)
    user_embedding = jax.random.normal(k_ue, (B, E), dtype=jnp.float32)
    w1 = jax.random.normal(k_w1, (1, E), dtype=jnp.float32) * 0.1
    w2 = jax.random.normal(k_w2, (L, E), dtype=jnp.float32) * 0.1

    out = jax.block_until_ready(instance_gating(user_item, user_embedding, w1, w2))
    ref = instance_gating_ref(user_item, user_embedding, w1, w2)
    assert out.shape == (B, E)
    assert jnp.allclose(out, ref, atol=2e-5, rtol=2e-5)

    # Test 2: exercise the tiled / pipelined path (multiple 128-lane grid
    # steps including a ragged last batch block).
    B2 = 300
    k_ui2, k_ue2 = jax.random.split(k_ui, 2)
    user_item2 = jax.random.normal(k_ui2, (B2, L, E), dtype=jnp.float32)
    user_embedding2 = jax.random.normal(k_ue2, (B2, E), dtype=jnp.float32)
    out2 = jax.block_until_ready(
        instance_gating(user_item2, user_embedding2, w1, w2)
    )
    ref2 = instance_gating_ref(user_item2, user_embedding2, w1, w2)
    assert out2.shape == (B2, E)
    assert jnp.allclose(out2, ref2, atol=2e-5, rtol=2e-5)

    print("KERNEL_OK")
</pallas_src>

<mosaic_0001>
module attributes {stable_mosaic.version = 11 : i64} {
  func.func @instance_gating_kernel(%arg0: i32, %arg1: memref<10x32x2xf32, #tpu.memory_space<vmem>>, %arg2: memref<10x2xf32, #tpu.memory_space<vmem>>, %arg3: memref<32x1xf32, #tpu.memory_space<vmem>>, %arg4: memref<32x2xf32, #tpu.memory_space<vmem>>) attributes {dimension_semantics = [#tpu.dimension_semantics<parallel>], iteration_bounds = array<i64: 1>, scalar_prefetch = 0 : i64, scratch_operands = 0 : i64, tpu.core_type = #tpu.core_type<tc>, window_params = [{transform_indices = @transform_0, window_bounds = array<i64: 10, 32, 2>}, {transform_indices = @transform_1, window_bounds = array<i64: 10, 2>}, {pipeline_mode = #tpu.pipeline_mode<synchronous>, transform_indices = @transform_2, window_bounds = array<i64: 32, 1>}, {transform_indices = @transform_3, window_bounds = array<i64: 32, 2>}]} {
    %c0 = arith.constant 0 : index
    %c0_0 = arith.constant 0 : index
    %c0_1 = arith.constant 0 : index
    %0 = vector.load %arg1[%c0, %c0_0, %c0_1] : memref<10x32x2xf32, #tpu.memory_space<vmem>>, vector<10x32x2xf32>
    %c0_2 = arith.constant 0 : index
    %c0_3 = arith.constant 0 : index
    %1 = vector.load %arg2[%c0_2, %c0_3] : memref<10x2xf32, #tpu.memory_space<vmem>>, vector<10x2xf32>
    %c0_4 = arith.constant 0 : index
    %c0_5 = arith.constant 0 : index
    %2 = vector.load %arg3[%c0_4, %c0_5] : memref<32x1xf32, #tpu.memory_space<vmem>>, vector<32x1xf32>
    %3 = vector.shape_cast %2 : vector<32x1xf32> to vector<1x32x1xf32>
    %4 = vector.broadcast %3 : vector<1x32x1xf32> to vector<10x32x2xf32>
    %5 = arith.mulf %0, %4 : vector<10x32x2xf32>
    %cst = arith.constant dense<0.000000e+00> : vector<10x2xf32>
    %6 = vector.multi_reduction <add>, %5, %cst [1] : vector<10x32x2xf32> to vector<10x2xf32>
    %7 = arith.addf %6, %1 : vector<10x2xf32>
    %8 = arith.negf %7 : vector<10x2xf32>
    %9 = math.exp %8 : vector<10x2xf32>
    %cst_6 = arith.constant 1.000000e+00 : f32
    %10 = vector.broadcast %cst_6 : f32 to vector<10x2xf32>
    %11 = arith.addf %10, %9 : vector<10x2xf32>
    %12 = arith.divf %10, %11 : vector<10x2xf32>
    %13 = vector.shape_cast %12 : vector<10x2xf32> to vector<10x1x2xf32>
    %14 = vector.broadcast %13 : vector<10x1x2xf32> to vector<10x32x2xf32>
    %15 = arith.mulf %14, %0 : vector<10x32x2xf32>
    %cst_7 = arith.constant dense<0.000000e+00> : vector<32x2xf32>
    %16 = vector.multi_reduction <add>, %15, %cst_7 [0] : vector<10x32x2xf32> to vector<32x2xf32>
    %cst_8 = arith.constant dense<0.000000e+00> : vector<2xf32>
    %17 = vector.multi_reduction <add>, %12, %cst_8 [0] : vector<10x2xf32> to vector<2xf32>
    %18 = vector.shape_cast %17 : vector<2xf32> to vector<1x2xf32>
    %19 = tpu.reciprocal %18 : vector<1x2xf32> -> vector<1x2xf32>
    %20 = vector.broadcast %19 : vector<1x2xf32> to vector<32x2xf32>
    %21 = arith.mulf %16, %20 : vector<32x2xf32>
    %c0_9 = arith.constant 0 : index
    %c0_10 = arith.constant 0 : index
    %22 = vector.load %arg4[%c0_9, %c0_10] : memref<32x2xf32, #tpu.memory_space<vmem>>, vector<32x2xf32>
    tpu.vector_store %arg4[%c0_9, %c0_10], %21 {strides = array<i32>} : memref<32x2xf32, #tpu.memory_space<vmem>>, vector<32x2xf32>,
    return
  }
  func.func @transform_0(%arg0: i32) -> (i32, i32, i32) {
    %c0_i32 = arith.constant 0 : i32
    %c0_i32_0 = arith.constant 0 : i32
    %c0_i32_1 = arith.constant 0 : i32
    return %c0_i32, %c0_i32_0, %arg0 : i32, i32, i32
  }
  func.func @transform_1(%arg0: i32) -> (i32, i32) {
    %c0_i32 = arith.constant 0 : i32
    %c0_i32_0 = arith.constant 0 : i32
    return %c0_i32, %arg0 : i32, i32
  }
  func.func @transform_2(%arg0: i32) -> (i32, i32) {
    %c0_i32 = arith.constant 0 : i32
    %c0_i32_0 = arith.constant 0 : i32
    %c0_i32_1 = arith.constant 0 : i32
    return %c0_i32, %c0_i32_0 : i32, i32
  }
  func.func @transform_3(%arg0: i32) -> (i32, i32) {
    %c0_i32 = arith.constant 0 : i32
    %c0_i32_0 = arith.constant 0 : i32
    return %c0_i32, %arg0 : i32, i32
  }
}

</mosaic_0001>

<bundles_post_ra>
// kernel: tpu_custom_call.1
= control target key start
LH: loop header
LB: loop body
LE: loop exit
PB: predicated region body
PF: predicated region fallthrough
CT: control target
= control target key end

     0   :  { %v614_v0 = vmov 0   ;;  %vm120_vm0 = vcmask 15360   ;;  %vm508_vm1 = vcmask 1041409   ;;  %vm511_vm2 = vcmask 1042434   ;;  %s1206_s2 = inlined_call_operand.vmem [shape: f32[32,1], index: 2, kind: input, shape index: {}]   ;;  %s1207_s1 = inlined_call_operand.vmem [shape: f32[10,2], index: 1, kind: input, shape index: {}]   ;;  %s1208_s0 = inlined_call_operand.vmem [shape: f32[10,32,2], index: 0, kind: input, shape index: {}]   ;;  %s1209_s3 = inlined_call_operand.vmem [shape: f32[32,2], index: 3, kind: output, shape index: {}]  }
   0x1   :  { %571 = vset.pattern.permute.xlu1 %v614_v0  ;;  %570 = vset.pattern.permute.xlu0 %v614_v0  ;;  %v58_v1 = vld [vmem:[%s1206_s2 + $0x10] sm:$0xff]  ;;  %v56_v2 = vld [vmem:[%s1206_s2] sm:$0xff]  ;;  %v59_v3 = vld [vmem:[%s1206_s2 + $0x18] sm:$0xff]  ;;  %vm514_vm3 = vcmask 1043459   ;;  %vm517_vm4 = vcmask 1044484   ;;  %vm520_vm5 = vcmask 1045509  }
   0x2   :  { %72 = vperm.xlu1 %571, %v58_v1   ;;  %62 = vperm.xlu0 %570, %v56_v2   ;;  %v57_v4 = vld [vmem:[%s1206_s2 + $0x8] sm:$0xff]  ;;  %v650_v5 = vld [vmem:[%s1208_s0 + $0x10] sm:$0xff]  ;;  %v670_v9 = vld [vmem:[%s1207_s1] sm:$0xff]  ;;  %vm523_vm6 = vcmask 1046534   ;;  %vm526_vm7 = vcmask 1047559   ;;  %vm533_vm8 = vcmask 9216  }
   0x3   :  { %v655_v6 = vld [vmem:[%s1208_s0 + $0x30] sm:$0xff]  ;;  %v705_v17 = vld [vmem:[%s1208_s0] sm:$0xff]  ;;  %v760_v35 = vld [vmem:[%s1208_s0 + $0x18] sm:$0xff] }
   0x4   :  { %v660_v7 = vld [vmem:[%s1208_s0 + $0x50] sm:$0xff]  ;;  %v710_v18 = vld [vmem:[%s1208_s0 + $0x20] sm:$0xff]  ;;  %v765_v36 = vld [vmem:[%s1208_s0 + $0x38] sm:$0xff] }
   0x5   :  { %1235 = vst [vmem:[#allocation2_spill] sm:$0xff] %v660_v7  ;;  %v665_v8 = vld [vmem:[%s1208_s0 + $0x70] sm:$0xff]  ;;  %v715_v19 = vld [vmem:[%s1208_s0 + $0x40] sm:$0xff]  ;;  %v787_v42 = vld [vmem:[%s1208_s0 + $0x58] sm:$0xff] }
   0x6   :  { %77 = vperm.xlu1 %571, %v59_v3   ;;  %67 = vperm.xlu0 %570, %v57_v4   ;;  %1236 = vst [vmem:[#allocation3_spill] sm:$0xff] %v665_v8  ;;  %v675_v10 = vld [vmem:[%s1208_s0 + $0x90] sm:$0xff]  ;;  %1243 = vst [vmem:[#allocation10_spill] sm:$0xff] %v715_v19  ;;  %v725_v24 = vld [vmem:[%s1208_s0 + $0x60] sm:$0xff] }
   0x7   :  { %1237 = vst [vmem:[#allocation4_spill] sm:$0xff] %v675_v10  ;;  %v680_v11 = vld [vmem:[%s1208_s0 + $0xb0] sm:$0xff]  ;;  %1244 = vst [vmem:[#allocation11_spill] sm:$0xff] %v725_v24  ;;  %v730_v25 = vld [vmem:[%s1208_s0 + $0x80] sm:$0xff] }
   0x8   :  { %1238 = vst [vmem:[#allocation5_spill] sm:$0xff] %v680_v11  ;;  %v685_v12 = vld [vmem:[%s1208_s0 + $0xd0] sm:$0xff]  ;;  %1245 = vst [vmem:[#allocation12_spill] sm:$0xff] %v730_v25  ;;  %v735_v26 = vld [vmem:[%s1208_s0 + $0xa0] sm:$0xff] }
   0x9   :  { %1239 = vst [vmem:[#allocation6_spill] sm:$0xff] %v685_v12  ;;  %v690_v13 = vld [vmem:[%s1208_s0 + $0xf0] sm:$0xff]  ;;  %1246 = vst [vmem:[#allocation13_spill] sm:$0xff] %v735_v26  ;;  %v755_v34 = vld [vmem:[%s1208_s0 + $0xc0] sm:$0xff] }
   0xa   :  { %1240 = vst [vmem:[#allocation7_spill] sm:$0xff] %v690_v13  ;;  %v695_v14 = vld [vmem:[%s1208_s0 + $0x110] sm:$0xff]  ;;  %1247 = vst [vmem:[#allocation14_spill] sm:$0xff] %v755_v34  ;;  %v782_v41 = vld [vmem:[%s1208_s0 + $0xe0] sm:$0xff] }
   0xb   :  { %1241 = vst [vmem:[#allocation8_spill] sm:$0xff] %v695_v14  ;;  %v700_v15 = vld [vmem:[%s1208_s0 + $0x130] sm:$0xff]  ;;  %1248 = vst [vmem:[#allocation15_spill] sm:$0xff] %v782_v41  ;;  %v792_v43 = vld [vmem:[%s1208_s0 + $0x78] sm:$0xff] }
   0xc   :  { %1242 = vst [vmem:[#allocation9_spill] sm:$0xff] %v700_v15  ;;  %1249 = vst [vmem:[#allocation16_spill] sm:$0xff] %v787_v42  ;;  %v797_v44 = vld [vmem:[%s1208_s0 + $0x98] sm:$0xff]  ;;  %v823_v53 = vld [vmem:[%s1208_s0 + $0x100] sm:$0xff] }
   0xd   :  { %1250 = vst [vmem:[#allocation17_spill] sm:$0xff] %v792_v43  ;;  %1251 = vst [vmem:[#allocation18_spill] sm:$0xff] %v797_v44  ;;  %v808_v50 = vld [vmem:[%s1208_s0 + $0xb8] sm:$0xff]  ;;  %v828_v54 = vld [vmem:[%s1208_s0 + $0x120] sm:$0xff] }
   0xe   :  { %1252 = vst [vmem:[#allocation19_spill] sm:$0xff] %v808_v50  ;;  %v813_v51 = vld [vmem:[%s1208_s0 + $0xd8] sm:$0xff]  ;;  %1255 = vst [vmem:[#allocation22_spill] sm:$0xff] %v823_v53  ;;  %v871_v20 = vld [vmem:[%s1208_s0 + $0x8] sm:$0xff] }
   0xf   :  { %1253 = vst [vmem:[#allocation20_spill] sm:$0xff] %v813_v51  ;;  %v818_v52 = vld [vmem:[%s1208_s0 + $0xf8] sm:$0xff]  ;;  %1256 = vst [vmem:[#allocation23_spill] sm:$0xff] %v828_v54 }
  0x10   :  { %1254 = vst [vmem:[#allocation21_spill] sm:$0xff] %v818_v52  ;;  %v841_v59 = vld [vmem:[%s1208_s0 + $0x118] sm:$0xff] }
  0x11   :  { %1257 = vst [vmem:[#allocation24_spill] sm:$0xff] %v841_v59  ;;  %v846_v60 = vld [vmem:[%s1208_s0 + $0x138] sm:$0xff] }
  0x12   :  { %1258 = vst [vmem:[#allocation25_spill] sm:$0xff] %v846_v60 }
  0x81   :  { %v73_v16 = vpop.permute.xlu1 %72  ;;  %v63_v23 = vpop.permute.xlu0 %62 }
  0x82   :  { %v720_v22 = vmul.f32 %v73_v16, %v650_v5  ;;  %v741_v30 = vmul.f32 %v73_v16, %v655_v6  ;;  %v744_v31 = vmul.f32 %v73_v16, %v660_v7  ;;  %v747_v32 = vmul.f32 %v73_v16, %v665_v8 }
  0x83   :  { %v750_v33 = vmul.f32 %v73_v16, %v675_v10  ;;  %v768_v37 = vmul.f32 %v73_v16, %v680_v11  ;;  %v771_v38 = vmul.f32 %v73_v16, %v685_v12  ;;  %v774_v39 = vmul.f32 %v73_v16, %v690_v13  ;;  %v897_v13 = vld [vmem:[%s1208_s0 + $0x88] sm:$0xff] }
  0x84   :  { %v777_v40 = vmul.f32 %v73_v16, %v695_v14  ;;  %v800_v45 = vmul.f32 %v73_v16, %v700_v15  ;;  %v80_v46 = vmul.f32 %v63_v23, %v705_v17  ;;  %v84_v47 = vmul.f32 %v63_v23, %v710_v18  ;;  %v876_v15 = vld [vmem:[%s1208_s0 + $0x28] sm:$0xff] }
  0x85   :  { %v88_v48 = vmul.f32 %v63_v23, %v715_v19  ;;  %v78_v49 = vpop.permute.xlu1 %77  ;;  %v92_v55 = vmul.f32 %v63_v23, %v725_v24  ;;  %v96_v56 = vmul.f32 %v63_v23, %v730_v25  ;;  %v833_v57 = vmul.f32 %v63_v23, %v735_v26  ;;  %v866_v21 = vpop.permute.xlu0 %67  ;;  %v881_v14 = vld [vmem:[%s1208_s0 + $0x48] sm:$0xff] }
  0x86   :  { %v836_v58 = vmul.f32 %v63_v23, %v755_v34  ;;  %v83_v61 = vmul.f32 %v78_v49, %v760_v35  ;;  %v87_v62 = vmul.f32 %v78_v49, %v765_v36  ;;  %v91_v63 = vmul.f32 %v78_v49, %v787_v42 }
  0x87   :  { %v95_v0 = vmul.f32 %v78_v49, %v792_v43  ;;  %v99_v1 = vmul.f32 %v78_v49, %v797_v44  ;;  %v103_v2 = vmul.f32 %v78_v49, %v808_v50  ;;  %v107_v3 = vmul.f32 %v78_v49, %v813_v51  ;;  %v920_v51 = vld [vmem:[%s1208_s0 + $0xe8] sm:$0xff] }
  0x88   :  { %v111_v4 = vmul.f32 %v78_v49, %v818_v52  ;;  %v857_v16 = vmul.f32 %v63_v23, %v782_v41  ;;  %v860_v29 = vmul.f32 %v63_v23, %v823_v53  ;;  %v863_v28 = vmul.f32 %v63_v23, %v828_v54  ;;  %v892_v52 = vld [vmem:[%s1208_s0 + $0x68] sm:$0xff]  ;;  %1259 = vst [vmem:[#allocation26_spill] sm:$0xff] %v920_v51 }
  0x89   :  { %v115_v27 = vmul.f32 %v78_v49, %v841_v59  ;;  %v884_v23 = vmul.f32 %v78_v49, %v846_v60  ;;  %v126_v54 = vsel %vm120_vm0, %v83_v61, 0.0  ;;  %v139_v59 = vsel %vm120_vm0, %v87_v62, 0.0  ;;  %v902_v49 = vld [vmem:[%s1208_s0 + $0xa8] sm:$0xff] }
  0x8a   :  { %v152_v53 = vsel %vm120_vm0, %v91_v63, 0.0  ;;  %v165_v61 = vsel %vm120_vm0, %v95_v0, 0.0  ;;  %v178_v62 = vsel %vm120_vm0, %v99_v1, 0.0  ;;  %v907_v63 = vsel %vm120_vm0, %v103_v2, 0.0  ;;  %v915_v41 = vld [vmem:[%s1208_s0 + $0xc8] sm:$0xff] }
  0x8b   :  { %v910_v60 = vsel %vm120_vm0, %v107_v3, 0.0  ;;  %v923_v0 = vsel %vm120_vm0, %v111_v4, 0.0  ;;  %v81_v1 = vmul.f32 %v866_v21, %v871_v20  ;;  %v85_v2 = vmul.f32 %v866_v21, %v876_v15 }
  0x8c   :  { %v89_v3 = vmul.f32 %v866_v21, %v881_v14  ;;  %v932_v12 = vsel %vm120_vm0, %v115_v27, 0.0  ;;  %v93_v34 = vmul.f32 %v866_v21, %v892_v52  ;;  %v97_v50 = vmul.f32 %v866_v21, %v897_v13 }
  0x8d   :  { %v101_v4 = vmul.f32 %v866_v21, %v902_v49  ;;  %v105_v11 = vmul.f32 %v866_v21, %v915_v41  ;;  %v944_v26 = vmul.f32 %v866_v21, %v920_v51  ;;  %v121_v44 = vsel %vm120_vm0, %v80_v46, 0.0 }
  0x8e   :  { %v122_v27 = vsel %vm120_vm0, %v81_v1, 0.0  ;;  %v124_v25 = vsel %vm120_vm0, %v720_v22, 0.0  ;;  %v134_v43 = vsel %vm120_vm0, %v84_v47, 0.0  ;;  %v135_v8 = vsel %vm120_vm0, %v85_v2, 0.0 }
  0x8f   :  { %v123_v10 = vadd.f32 %v122_v27, %v121_v44  ;;  %v136_v24 = vadd.f32 %v135_v8, %v134_v43  ;;  %v137_v42 = vsel %vm120_vm0, %v741_v30, 0.0  ;;  %v147_v7 = vsel %vm120_vm0, %v88_v48, 0.0 }
  0x90   :  { %v148_v51 = vsel %vm120_vm0, %v89_v3, 0.0  ;;  %v150_v44 = vsel %vm120_vm0, %v744_v31, 0.0  ;;  %v160_v1 = vsel %vm120_vm0, %v92_v55, 0.0  ;;  %v161_v47 = vsel %vm120_vm0, %v93_v34, 0.0 }
  0x91   :  { %v125_v19 = vadd.f32 %v124_v25, %v123_v10  ;;  %v149_v46 = vadd.f32 %v148_v51, %v147_v7  ;;  %v138_v22 = vadd.f32 %v137_v42, %v136_v24  ;;  %v163_v8 = vsel %vm120_vm0, %v747_v32, 0.0 }
  0x92   :  { %v173_v43 = vsel %vm120_vm0, %v96_v56, 0.0  ;;  %v162_v48 = vadd.f32 %v161_v47, %v160_v1  ;;  %v174_v3 = vsel %vm120_vm0, %v97_v50, 0.0  ;;  %v176_v25 = vsel %vm120_vm0, %v750_v33, 0.0 }
  0x93   :  { %v127_v30 = vadd.f32 %v126_v54, %v125_v19  ;;  %v151_v2 = vadd.f32 %v150_v44, %v149_v46  ;;  %v140_v10 = vadd.f32 %v139_v59, %v138_v22  ;;  %v175_v7 = vadd.f32 %v174_v3, %v173_v43 }
  0x94   :  { %v186_v24 = vsel %vm120_vm0, %v833_v57, 0.0  ;;  %v164_v42 = vadd.f32 %v163_v8, %v162_v48  ;;  %v187_v32 = vsel %vm120_vm0, %v101_v4, 0.0  ;;  %v189_v54 = vsel %vm120_vm0, %v768_v37, 0.0  ;;  %v977_v4 = vld [vmem:[%s1208_s0 + $0x108] sm:$0xff] }
  0x95   :  { %v128_v31 = vrot.slane %v127_v30, 4  ;;  %v153_v34 = vadd.f32 %v152_v53, %v151_v2  ;;  %v141_v51 = vrot.slane %v140_v10, 4  ;;  %v177_v55 = vadd.f32 %v176_v25, %v175_v7  ;;  %v987_v7 = vld [vmem:[%s1208_s0 + $0x128] sm:$0xff] }
  0x96   :  { %v188_v19 = vadd.f32 %v187_v32, %v186_v24  ;;  %v166_v59 = vadd.f32 %v165_v61, %v164_v42  ;;  %v199_v33 = vsel %vm120_vm0, %v836_v58, 0.0  ;;  %v200_v53 = vsel %vm120_vm0, %v105_v11, 0.0 }
  0x97   :  { %v129_v50 = vadd.f32 %v128_v31, %v127_v30  ;;  %v154_v56 = vrot.slane %v153_v34, 4  ;;  %v142_v27 = vadd.f32 %v141_v51, %v140_v10  ;;  %v179_v46 = vadd.f32 %v178_v62, %v177_v55 }
  0x98   :  { %v190_v57 = vadd.f32 %v189_v54, %v188_v19  ;;  %v167_v22 = vrot.slane %v166_v59, 4  ;;  %v201_v37 = vadd.f32 %v200_v53, %v199_v33  ;;  %v202_v58 = vsel %vm120_vm0, %v771_v38, 0.0 }
  0x99   :  { %v130_v44 = vrot.slane %v129_v50, 2  ;;  %v155_v1 = vadd.f32 %v154_v56, %v153_v34  ;;  %v143_v47 = vrot.slane %v142_v27, 2  ;;  %v180_v8 = vrot.slane %v179_v46, 4 }
  0x9a   :  { %v192_v61 = vadd.f32 %v907_v63, %v190_v57  ;;  %v168_v30 = vadd.f32 %v167_v22, %v166_v59  ;;  %v203_v11 = vadd.f32 %v202_v58, %v201_v37  ;;  %v113_v2 = vmul.f32 %v866_v21, %v977_v4 }
  0x9b   :  { %v131_v62 = vadd.f32 %v130_v44, %v129_v50  ;;  %v156_v43 = vrot.slane %v155_v1, 2  ;;  %v144_v48 = vadd.f32 %v143_v47, %v142_v27  ;;  %v181_v3 = vadd.f32 %v180_v8, %v179_v46 }
  0x9c   :  { %v193_v10 = vrot.slane %v192_v61, 4  ;;  %v169_v24 = vrot.slane %v168_v30, 2  ;;  %v205_v38 = vadd.f32 %v910_v60, %v203_v11  ;;  %v213_v32 = vsel %vm120_vm0, %v944_v26, 0.0 }
  0x9d   :  { %v132_v25 = vrot.slane %v131_v62, 1  ;;  %v157_v63 = vadd.f32 %v156_v43, %v155_v1  ;;  %v145_v31 = vrot.slane %v144_v48, 1  ;;  %v182_v34 = vrot.slane %v181_v3, 2 }
  0x9e   :  { %v194_v42 = vadd.f32 %v193_v10, %v192_v61  ;;  %v170_v55 = vadd.f32 %v169_v24, %v168_v30  ;;  %v206_v19 = vrot.slane %v205_v38, 4  ;;  %v212_v54 = vsel %vm120_vm0, %v857_v16, 0.0 }
  0x9f   :  { %v158_v51 = vrot.slane %v157_v63, 1  ;;  %v117_v50 = vmul.f32 %v866_v21, %v987_v7  ;;  %v183_v56 = vadd.f32 %v182_v34, %v181_v3  ;;  %v214_v33 = vadd.f32 %v213_v32, %v212_v54 }
  0xa0   :  { %v195_v59 = vrot.slane %v194_v42, 2  ;;  %v133_v27 = vadd.f32 %v132_v25, %v131_v62  ;;  %v171_v60 = vrot.slane %v170_v55, 1  ;;  %v207_v46 = vadd.f32 %v206_v19, %v205_v38 }
  0xa1   :  { %v215_v57 = vsel %vm120_vm0, %v774_v39, 0.0  ;;  %v146_v53 = vadd.f32 %v145_v31, %v144_v48  ;;  %v184_v26 = vrot.slane %v183_v56, 1  ;;  %v159_v22 = vadd.f32 %v158_v51, %v157_v63 }
  0xa2   :  { %v196_v44 = vadd.f32 %v195_v59, %v194_v42  ;;  %v216_v1 = vadd.f32 %v215_v57, %v214_v33  ;;  %v208_v37 = vrot.slane %v207_v46, 2  ;;  %v225_v16 = vsel %vm120_vm0, %v860_v29, 0.0 }
  0xa3   :  { %v226_v21 = vsel %vm120_vm0, %v113_v2, 0.0  ;;  %v172_v47 = vadd.f32 %v171_v60, %v170_v55  ;;  %v228_v58 = vsel %vm120_vm0, %v777_v40, 0.0  ;;  %v238_v43 = vsel %vm120_vm0, %v863_v28, 0.0 }
  0xa4   :  { %v197_v8 = vrot.slane %v196_v44, 1  ;;  %v227_v61 = vadd.f32 %v226_v21, %v225_v16  ;;  %v209_v62 = vadd.f32 %v208_v37, %v207_v46  ;;  %v218_v39 = vadd.f32 %v923_v0, %v216_v1 }
  0xa5   :  { %v239_v30 = vsel %vm120_vm0, %v117_v50, 0.0  ;;  %v185_v11 = vadd.f32 %v184_v26, %v183_v56  ;;  %v241_v29 = vsel %vm120_vm0, %v800_v45, 0.0  ;;  %v271_v10 = vadd.f32 %v133_v27, %v670_v9 }
  0xa6   :  { %v229_v48 = vadd.f32 %v228_v58, %v227_v61  ;;  %v240_v3 = vadd.f32 %v239_v30, %v238_v43  ;;  %v210_v2 = vrot.slane %v209_v62, 1  ;;  %v1260_v25 = vrot.slane %v670_v9, 1 }
  0xa7   :  { %v1261_v63 = vrot.slane %v670_v9, 2  ;;  %v198_v24 = vadd.f32 %v197_v8, %v196_v44  ;;  %v1262_v31 = vrot.slane %v670_v9, 3  ;;  %v243_v42 = vsel %vm120_vm0, %v884_v23, 0.0 }
  0xa8   :  { %v272_v40 = vadd.f32 %v1260_v25, %v146_v53  ;;  %v231_v28 = vadd.f32 %v932_v12, %v229_v48  ;;  %v242_v38 = vadd.f32 %v241_v29, %v240_v3  ;;  %v219_v45 = vrot.slane %v218_v39, 4 }
  0xa9   :  { %v273_v0 = vadd.f32 %v1261_v63, %v159_v22  ;;  %v274_v34 = vadd.f32 %v1262_v31, %v172_v47  ;;  %v258_v32 = vrot.slane %v670_v9, 6  ;;  %v559_v51 = vmul.f32 -1.442695, %v271_v10 }
  0xaa   :  { %v211_v55 = vadd.f32 %v210_v2, %v209_v62  ;;  %v244_v19 = vadd.f32 %v243_v42, %v242_v38  ;;  %v1263_v54 = vrot.slane %v670_v9, 4  ;;  %v560_v56 = vmul.f32 -1.442695, %v272_v40 }
  0xab   :  { %v232_v59 = vrot.slane %v231_v28, 4  ;;  %572 = vpow2.f32 %v559_v51  ;;  %v561_v12 = vmul.f32 -1.442695, %v273_v0  ;;  %v1264_v27 = vrot.slane %v670_v9, 5 }
  0xac   :  { %v275_v50 = vadd.f32 %v1263_v54, %v185_v11  ;;  %v245_v33 = vrot.slane %v244_v19, 4  ;;  %574 = vpow2.f32 %v560_v56  ;;  %v562_v46 = vmul.f32 -1.442695, %v274_v34 }
  0xad   :  { %v276_v60 = vadd.f32 %v1264_v27, %v198_v24  ;;  %v220_v23 = vadd.f32 %v219_v45, %v218_v39  ;;  %v277_v53 = vadd.f32 %v258_v32, %v211_v55  ;;  %576 = vpow2.f32 %v561_v12  ;;  %v55_v39 = vld [vmem:[%s1207_s1 + $0x8] sm:$0x3] }
  0xae   :  { %v246_v57 = vadd.f32 %v245_v33, %v244_v19  ;;  %v563_v26 = vmul.f32 -1.442695, %v275_v50  ;;  %v233_v44 = vadd.f32 %v232_v59, %v231_v28  ;;  %578 = vpow2.f32 %v562_v46 }
  0xaf   :  { %v564_v22 = vmul.f32 -1.442695, %v276_v60  ;;  %v221_v37 = vrot.slane %v220_v23, 2  ;;  %v565_v21 = vmul.f32 -1.442695, %v277_v53  ;;  %v260_v10 = vrot.slane %v55_v39, 1 }
  0xb0   :  { %v247_v1 = vrot.slane %v246_v57, 2  ;;  %580 = vpow2.f32 %v563_v26  ;;  %v234_v47 = vrot.slane %v233_v44, 2  ;;  %v341_v0 = vlaneseq }
  0xb1   :  { %582 = vpow2.f32 %v564_v22  ;;  %v222_v61 = vadd.f32 %v221_v37, %v220_v23  ;;  %v259_v28 = vrot.slane %v670_v9, 7 }
  0xb2   :  { %v248_v16 = vadd.f32 %v247_v1, %v246_v57  ;;  %584 = vpow2.f32 %v565_v21  ;;  %v235_v43 = vadd.f32 %v234_v47, %v233_v44  ;;  %v342_v51 = vshrl.u32 %v341_v0, 7 }
  0xb3   :  { %v223_v48 = vrot.slane %v222_v61, 1 }
  0xb4   :  { %v249_v62 = vrot.slane %v248_v16, 1  ;;  %v236_v25 = vrot.slane %v235_v43, 1  ;;  %v1028_v59 = vsub.s32 0, %v342_v51 }
  0xb5   :  { %v573_v8 = vpop.eup %572  ;;  %v224_v24 = vadd.f32 %v223_v48, %v222_v61 }
  0xb6   :  { %v575_v58 = vpop.eup %574  ;;  %v311_v11 = vadd.f32 1.0, %v573_v8  ;;  %v250_v2 = vadd.f32 %v249_v62, %v248_v16  ;;  %v237_v42 = vadd.f32 %v236_v25, %v235_v43 }
  0xb7   :  { %v577_v30 = vpop.eup %576  ;;  %v312_v3 = vadd.f32 1.0, %v575_v58  ;;  %v278_v55 = vadd.f32 %v259_v28, %v224_v24 }
  0xb8   :  { %v579_v29 = vpop.eup %578  ;;  %v313_v40 = vadd.f32 1.0, %v577_v30  ;;  %586 = vrcp.f32 %v311_v11  ;;  %v280_v34 = vadd.f32 %v260_v10, %v250_v2  ;;  %v279_v50 = vadd.f32 %v237_v42, %v55_v39 }
  0xb9   :  { %v314_v38 = vadd.f32 1.0, %v579_v29  ;;  %588 = vrcp.f32 %v312_v3  ;;  %v566_v12 = vmul.f32 -1.442695, %v278_v55 }
  0xba   :  { %v581_v63 = vpop.eup %580  ;;  %590 = vrcp.f32 %v313_v40  ;;  %v568_v54 = vmul.f32 -1.442695, %v280_v34  ;;  %v567_v27 = vmul.f32 -1.442695, %v279_v50  ;;  %v1266_v50 = vld [vmem:[#allocation2_spill] sm:$0xff] }
  0xbb   :  { %v583_v31 = vpop.eup %582  ;;  %v315_v45 = vadd.f32 1.0, %v581_v63  ;;  %592 = vrcp.f32 %v314_v38 }
  0xbc   :  { %v585_v32 = vpop.eup %584  ;;  %v316_v19 = vadd.f32 1.0, %v583_v31 }
  0xbd   :  { %v317_v56 = vadd.f32 1.0, %v585_v32  ;;  %594 = vrcp.f32 %v315_v45 }
  0xbe   :  { %596 = vrcp.f32 %v316_v19 }
  0xbf   :  { %598 = vpow2.f32 %v568_v54 }
  0xc0   :  { %600 = vrcp.f32 %v317_v56 }
  0xc1   :  { %602 = vpow2.f32 %v566_v12  ;;  %v1267_v12 = vld [vmem:[#allocation16_spill] sm:$0xff] }
  0xc2   :  { %v1030_v9 = vpop.eup %586  ;;  %604 = vpow2.f32 %v567_v27 }
  0xc3   :  { %v1032_v33 = vpop.eup %588  ;;  %v344_v46 = vrot.slane %v1030_v9, %v1028_v59 }
  0xc4   :  { %v1034_v60 = vpop.eup %590  ;;  %v348_v23 = vrot.slane %v1032_v33, %v1028_v59  ;;  %v507_v34 = vrot.slane %v1032_v33, 7 }
  0xc5   :  { %v1040_v57 = vpop.eup %592  ;;  %v352_v53 = vrot.slane %v1034_v60, %v1028_v59  ;;  %v382_v44 = vmul.f32 %v344_v46, %v871_v20  ;;  %v381_v24 = vmul.f32 %v344_v46, %v705_v17 }
  0xc6   :  { %v1049_v1 = vrot.slane %v1040_v57, %v1028_v59  ;;  %v386_v22 = vmul.f32 %v348_v23, %v876_v15  ;;  %v385_v28 = vmul.f32 %v348_v23, %v710_v18  ;;  %v387_v42 = vmul.f32 %v348_v23, %v655_v6  ;;  %v1265_v18 = vld [vmem:[#allocation10_spill] sm:$0xff] }
  0xc7   :  { %v1044_v26 = vpop.eup %594  ;;  %v390_v47 = vmul.f32 %v352_v53, %v881_v14  ;;  %v440_v61 = vsel %vm120_vm0, %v382_v44, 0.0  ;;  %v388_v45 = vmul.f32 %v348_v23, %v765_v36  ;;  %v509_v19 = vsel %vm508_vm1, %v507_v34, %v1030_v9  ;;  %v1268_v23 = vld [vmem:[#allocation11_spill] sm:$0xff] }
  0xc8   :  { %v1052_v37 = vpop.eup %596  ;;  %v1056_v21 = vrot.slane %v1044_v26, %v1028_v59  ;;  %v394_v15 = vmul.f32 %v1049_v1, %v892_v52  ;;  %v441_v58 = vsel %vm120_vm0, %v386_v22, 0.0  ;;  %v422_v17 = vsel %vm120_vm0, %v385_v28, 0.0  ;;  %v1269_v22 = vld [vmem:[#allocation3_spill] sm:$0xff] }
  0xc9   :  { %v599_v16 = vpop.eup %598  ;;  %v1064_v20 = vrot.slane %v1052_v37, %v1028_v59  ;;  %v442_v39 = vadd.f32 %v441_v58, %v440_v61  ;;  %v443_v11 = vsel %vm120_vm0, %v390_v47, 0.0  ;;  %v460_v36 = vsel %vm120_vm0, %v387_v42, 0.0  ;;  %v1270_v47 = vld [vmem:[#allocation17_spill] sm:$0xff] }
  0xca   :  { %v1059_v8 = vpop.eup %600  ;;  %v320_v43 = vadd.f32 1.0, %v599_v16  ;;  %v398_v14 = vmul.f32 %v1056_v21, %v897_v13  ;;  %v445_v2 = vsel %vm120_vm0, %v394_v15, 0.0  ;;  %v479_v55 = vsel %vm120_vm0, %v388_v45, 0.0 }
  0xcb   :  { %v603_v62 = vpop.eup %602  ;;  %v1071_v30 = vrot.slane %v1059_v8, %v1028_v59  ;;  %v444_v3 = vadd.f32 %v443_v11, %v442_v39  ;;  %v402_v52 = vmul.f32 %v1064_v20, %v902_v49  ;;  %v383_v49 = vmul.f32 %v344_v46, %v650_v5 }
  0xcc   :  { %v605_v48 = vpop.eup %604  ;;  %v318_v29 = vadd.f32 1.0, %v603_v62  ;;  %606 = vrcp.f32 %v320_v43  ;;  %v447_v63 = vsel %vm120_vm0, %v398_v14, 0.0  ;;  %v421_v5 = vsel %vm120_vm0, %v381_v24, 0.0 }
  0xcd   :  { %v446_v10 = vadd.f32 %v445_v2, %v444_v3  ;;  %v319_v25 = vadd.f32 1.0, %v605_v48  ;;  %v406_v40 = vmul.f32 %v1071_v30, %v915_v41  ;;  %v449_v13 = vsel %vm120_vm0, %v402_v52, 0.0 }
  0xce   :  { %608 = vrcp.f32 %v318_v29  ;;  %v384_v41 = vmul.f32 %v344_v46, %v760_v35  ;;  %v389_v35 = vmul.f32 %v352_v53, %v1265_v18  ;;  %v459_v6 = vsel %vm120_vm0, %v383_v49, 0.0 }
  0xcf   :  { %v448_v0 = vadd.f32 %v447_v63, %v446_v10  ;;  %610 = vrcp.f32 %v319_v25  ;;  %v451_v31 = vsel %vm120_vm0, %v406_v40, 0.0  ;;  %v391_v56 = vmul.f32 %v352_v53, %v1266_v50  ;;  %v1271_v63 = vld [vmem:[#allocation12_spill] sm:$0xff] }
  0xd0   :  { %v478_v51 = vsel %vm120_vm0, %v384_v41, 0.0  ;;  %v392_v33 = vmul.f32 %v352_v53, %v1267_v12  ;;  %v423_v27 = vadd.f32 %v422_v17, %v421_v5  ;;  %v510_v46 = vrot.slane %v1034_v60, 6 }
  0xd1   :  { %v450_v38 = vadd.f32 %v449_v13, %v448_v0  ;;  %v393_v44 = vmul.f32 %v1049_v1, %v1268_v23  ;;  %v395_v16 = vmul.f32 %v1049_v1, %v1269_v22  ;;  %v396_v61 = vmul.f32 %v1049_v1, %v1270_v47  ;;  %v1272_v13 = vld [vmem:[#allocation4_spill] sm:$0xff] }
  0xd2   :  { %v513_v9 = vrot.slane %v1040_v57, 5  ;;  %v461_v58 = vadd.f32 %v460_v36, %v459_v6  ;;  %v480_v62 = vadd.f32 %v479_v55, %v478_v51  ;;  %v512_v39 = vsel %vm511_vm2, %v510_v46, %v509_v19  ;;  %v1274_v6 = vld [vmem:[#allocation13_spill] sm:$0xff]  ;;  %v1276_v55 = vld [vmem:[#allocation19_spill] sm:$0xff] }
  0xd3   :  { %v1091_v32 = vadd.f32 %v451_v31, %v450_v38  ;;  %v516_v53 = vrot.slane %v1044_v26, 4  ;;  %v424_v60 = vsel %vm120_vm0, %v389_v35, 0.0  ;;  %v519_v14 = vrot.slane %v1052_v37, 3  ;;  %v1275_v51 = vld [vmem:[#allocation5_spill] sm:$0xff] }
  0xd4   :  { %v515_v43 = vsel %vm514_vm3, %v513_v9, %v512_v39  ;;  %v425_v3 = vadd.f32 %v424_v60, %v423_v27  ;;  %v462_v1 = vsel %vm120_vm0, %v391_v56, 0.0  ;;  %v522_v29 = vrot.slane %v1059_v8, 2  ;;  %v1273_v8 = vld [vmem:[#allocation18_spill] sm:$0xff] }
  0xd5   :  { %v518_v57 = vsel %vm517_vm4, %v516_v53, %v515_v43  ;;  %v481_v52 = vsel %vm120_vm0, %v392_v33, 0.0  ;;  %v463_v25 = vadd.f32 %v462_v1, %v461_v58  ;;  %v397_v0 = vmul.f32 %v1056_v21, %v1271_v63  ;;  %v1281_v1 = vld [vmem:[#allocation26_spill] sm:$0xff] }
  0xd6   :  { %v1102_v54 = vpop.eup %606  ;;  %v521_v26 = vsel %vm520_vm5, %v519_v14, %v518_v57  ;;  %v482_v40 = vadd.f32 %v481_v52, %v480_v62  ;;  %v399_v24 = vmul.f32 %v1056_v21, %v1272_v13  ;;  %v400_v38 = vmul.f32 %v1056_v21, %v1273_v8 }
  0xd7   :  { %v528_v11 = vrot.slane %v1102_v54, 7  ;;  %v524_v37 = vsel %vm523_vm6, %v522_v29, %v521_v26  ;;  %v426_v49 = vsel %vm120_vm0, %v393_v44, 0.0  ;;  %v464_v42 = vsel %vm120_vm0, %v395_v16, 0.0  ;;  %v1277_v16 = vld [vmem:[#allocation14_spill] sm:$0xff]  ;;  %v1282_v26 = vld [vmem:[#allocation7_spill] sm:$0xff] }
  0xd8   :  { %v609_v15 = vpop.eup %608  ;;  %v427_v41 = vadd.f32 %v426_v49, %v425_v3  ;;  %v483_v45 = vsel %vm120_vm0, %v396_v61, 0.0  ;;  %v465_v17 = vadd.f32 %v464_v42, %v463_v25  ;;  %v401_v36 = vmul.f32 %v1064_v20, %v1274_v6  ;;  %v1278_v61 = vld [vmem:[#allocation6_spill] sm:$0xff] }
  0xd9   :  { %v611_v48 = vpop.eup %610  ;;  %v525_v2 = vrot.slane %v609_v15, 1  ;;  %v484_v18 = vadd.f32 %v483_v45, %v482_v40  ;;  %v403_v21 = vmul.f32 %v1064_v20, %v1275_v51  ;;  %v404_v19 = vmul.f32 %v1064_v20, %v1276_v55  ;;  %v1279_v20 = vld [vmem:[#allocation20_spill] sm:$0xff] }
  0xda   :  { %v529_v10 = vsel %vm508_vm1, %v528_v11, %v611_v48  ;;  %v428_v50 = vsel %vm120_vm0, %v397_v0, 0.0  ;;  %v466_v12 = vsel %vm120_vm0, %v399_v24, 0.0  ;;  %v485_v33 = vsel %vm120_vm0, %v400_v38, 0.0  ;;  %v1280_v11 = vld [vmem:[#allocation15_spill] sm:$0xff] }
  0xdb   :  { %v527_v28 = vsel %vm526_vm7, %v525_v2, %v524_v37  ;;  %v534_v34 = vsel %vm533_vm8, %v529_v10, 0.0  ;;  %v429_v56 = vadd.f32 %v428_v50, %v427_v41  ;;  %v467_v46 = vadd.f32 %v466_v12, %v465_v17  ;;  %v1286_v41 = vld [vmem:[#allocation24_spill] sm:$0xff] }
  0xdc   :  { %v532_v31 = vsel %vm120_vm0, %v527_v28, 0.0  ;;  %v486_v23 = vadd.f32 %v485_v33, %v484_v18  ;;  %v372_v44 = vrot.slane %v609_v15, %v1028_v59  ;;  %v405_v47 = vmul.f32 %v1071_v30, %v1277_v16 }
  0xdd   :  { %v535_v5 = vadd.f32 %v534_v34, %v532_v31  ;;  %v407_v9 = vmul.f32 %v1071_v30, %v1278_v61  ;;  %v408_v58 = vmul.f32 %v1071_v30, %v1279_v20  ;;  %v430_v62 = vsel %vm120_vm0, %v401_v36, 0.0  ;;  %v1283_v30 = vld [vmem:[#allocation21_spill] sm:$0xff]  ;;  %v1285_v31 = vld [vmem:[#allocation8_spill] sm:$0xff]  ;;  %v1287_v36 = vld [vmem:[#allocation23_spill] sm:$0xff] }
  0xde   :  { %v431_v39 = vadd.f32 %v430_v62, %v429_v56  ;;  %v468_v53 = vsel %vm120_vm0, %v403_v21, 0.0  ;;  %v487_v60 = vsel %vm120_vm0, %v404_v19, 0.0  ;;  %v409_v3 = vmul.f32 %v372_v44, %v1280_v11  ;;  %v1289_v19 = vld [vmem:[#allocation25_spill] sm:$0xff] }
  0xdf   :  { %v536_v35 = vrot.slane %v535_v5, 4  ;;  %v469_v14 = vadd.f32 %v468_v53, %v467_v46  ;;  %v488_v15 = vadd.f32 %v487_v60, %v486_v23  ;;  %v410_v57 = vmul.f32 %v372_v44, %v1281_v1 }
  0xe0   :  { %v376_v52 = vrot.slane %v611_v48, %v1028_v59  ;;  %v411_v2 = vmul.f32 %v372_v44, %v1282_v26  ;;  %v412_v10 = vmul.f32 %v372_v44, %v1283_v30  ;;  %v432_v25 = vsel %vm120_vm0, %v405_v47, 0.0  ;;  %v1284_v48 = vld [vmem:[#allocation22_spill] sm:$0xff] }
  0xe1   :  { %v537_v27 = vadd.f32 %v536_v35, %v535_v5  ;;  %v433_v40 = vadd.f32 %v432_v25, %v431_v39  ;;  %v470_v37 = vsel %vm120_vm0, %v407_v9, 0.0  ;;  %v489_v63 = vsel %vm120_vm0, %v408_v58, 0.0 }
  0xe2   :  { %v471_v13 = vadd.f32 %v470_v37, %v469_v14  ;;  %v490_v24 = vadd.f32 %v489_v63, %v488_v15  ;;  %v380_v28 = vrot.slane %v1102_v54, %v1028_v59  ;;  %v434_v8 = vsel %vm120_vm0, %v409_v3, 0.0 }
  0xe3   :  { %v538_v22 = vrot.slane %v537_v27, 2  ;;  %v413_v38 = vmul.f32 %v376_v52, %v1284_v48  ;;  %v414_v49 = vmul.f32 %v376_v52, %v977_v4  ;;  %v415_v34 = vmul.f32 %v376_v52, %v1285_v31  ;;  %v1288_v4 = vld [vmem:[#allocation9_spill] sm:$0xff] }
  0xe4   :  { %v416_v42 = vmul.f32 %v376_v52, %v1286_v41  ;;  %v435_v45 = vadd.f32 %v434_v8, %v433_v40  ;;  %v453_v5 = vsel %vm120_vm0, %v410_v57, 0.0  ;;  %v472_v17 = vsel %vm120_vm0, %v411_v2, 0.0 }
  0xe5   :  { %v539_v43 = vadd.f32 %v538_v22, %v537_v27  ;;  %v491_v18 = vsel %vm120_vm0, %v412_v10, 0.0  ;;  %v454_v54 = vadd.f32 %v453_v5, %v1091_v32  ;;  %v473_v35 = vadd.f32 %v472_v17, %v471_v13 }
  0xe6   :  { %v492_v6 = vadd.f32 %v491_v18, %v490_v24  ;;  %v417_v51 = vmul.f32 %v380_v28, %v1287_v36  ;;  %v418_v21 = vmul.f32 %v380_v28, %v987_v7  ;;  %v419_v55 = vmul.f32 %v380_v28, %v1288_v4 }
  0xe7   :  { %v540_v29 = vrot.slane %v539_v43, 1  ;;  %v420_v50 = vmul.f32 %v380_v28, %v1289_v19  ;;  %v436_v56 = vsel %vm120_vm0, %v413_v38, 0.0  ;;  %v455_v33 = vsel %vm120_vm0, %v414_v49, 0.0 }
  0xe8   :  { %v437_v12 = vadd.f32 %v436_v56, %v435_v45  ;;  %v474_v27 = vsel %vm120_vm0, %v415_v34, 0.0  ;;  %v493_v46 = vsel %vm120_vm0, %v416_v42, 0.0  ;;  %v456_v32 = vadd.f32 %v455_v33, %v454_v54 }
  0xe9   :  { %v541_v0 = vadd.f32 %v540_v29, %v539_v43  ;;  %v475_v23 = vadd.f32 %v474_v27, %v473_v35  ;;  %v494_v44 = vadd.f32 %v493_v46, %v492_v6  ;;  %v438_v22 = vsel %vm120_vm0, %v417_v51, 0.0 }
  0xea   :  { %v439_v7 = vadd.f32 %v438_v22, %v437_v12  ;;  %v457_v47 = vsel %vm120_vm0, %v418_v21, 0.0  ;;  %v476_v61 = vsel %vm120_vm0, %v419_v55, 0.0  ;;  %v495_v9 = vsel %vm120_vm0, %v420_v50, 0.0 }
  0xeb   :  { %612 = vrcp.f32 %v541_v0  ;;  %v458_v20 = vadd.f32 %v457_v47, %v456_v32  ;;  %v477_v58 = vadd.f32 %v476_v61, %v475_v23  ;;  %v496_v62 = vadd.f32 %v495_v9, %v494_v44 }
  0xf5   :  { %v613_v16 = vpop.eup %612 }
  0xf6   :  { %v546_v39 = vrot.slane %v613_v16, %v1028_v59 }
  0xf8   :  { %v547_v53 = vmul.f32 %v546_v39, %v439_v7  ;;  %v548_v60 = vmul.f32 %v546_v39, %v458_v20  ;;  %v549_v43 = vmul.f32 %v546_v39, %v477_v58  ;;  %v550_v14 = vmul.f32 %v546_v39, %v496_v62 }
  0xfa   :  { %551 = vst.msk [vmem:[%s1209_s3] sm:$0xff] %vm120_vm0, %v547_v53  ;;  %552 = vst.msk [vmem:[%s1209_s3 + $0x8] sm:$0xff] %vm120_vm0, %v548_v60 }
  0xfb   :  { %553 = vst.msk [vmem:[%s1209_s3 + $0x10] sm:$0xff] %vm120_vm0, %v549_v43  ;;  %554 = vst.msk [vmem:[%s1209_s3 + $0x18] sm:$0xff] %vm120_vm0, %v550_v14 }

</bundles_post_ra>
